<compile_context>
chip_gen: v5e
topology: v5e:2x2
jax: 0.10.0
libtpu: 0.0.40
codegen_flags: <defaults>
</compile_context>

<pallas_src>
import jax
import jax.numpy as jnp
from jax.experimental import pallas as pl
from jax.experimental.pallas import tpu as pltpu


def _round_up(x, m):
    return ((x + m - 1) // m) * m


def _chip_defaults():
    """Per-generation (pack, tile_b, vmem_limit_bytes)."""
    kind = ""
    try:
        kind = jax.devices()[0].device_kind.lower()
    except Exception:
        pass
    if "v6" in kind:
        # 918 TF/s MXU, 128 MiB VMEM: 32x packing stays memory-bound and gives
        # a natively 128-lane output.
        return 32, 65536, 96 * 1024 * 1024
    if "v7" in kind or "7x" in kind:
        # 64 MiB VMEM per TC, 2 TCs, very high HBM BW: smaller tiles/packing.
        return 16, 32768, 48 * 1024 * 1024
    if "v5" in kind:
        # 197 TF/s MXU: cap packing at 16x to stay memory-bound.
        return 16, 65536, 96 * 1024 * 1024
    return 16, 32768, 48 * 1024 * 1024


def mlp_kernel(x_ref, w1_ref, b1_ref, w2_ref, b2_ref, w3_ref, b3_ref, o_ref):
    # Fused 3-layer MLP on one row-packed batch tile.  Weights / biases are
    # VMEM residents (constant index_map).  x arrives f32 straight from HBM
    # and is cast to bf16 here, so the wrapper never touches x again.
    x = x_ref[...].astype(w1_ref.dtype)

    h1 = jnp.dot(x, w1_ref[...], preferred_element_type=jnp.float32) + b1_ref[...]
    h1 = jnp.maximum(h1, 0.0)

    h2 = jnp.dot(h1.astype(w2_ref.dtype), w2_ref[...],
                 preferred_element_type=jnp.float32) + b2_ref[...]
    h2 = jnp.maximum(h2, 0.0)

    y = jnp.dot(h2.astype(w3_ref.dtype), w3_ref[...],
                preferred_element_type=jnp.float32) + b3_ref[...]
    o_ref[...] = y.astype(o_ref.dtype)


def mlp_forward(x, params, *, pack=None, tile_b=None, vmem_limit_bytes=None,
                compute_dtype=jnp.bfloat16):
    w1, b1, w2, b2, w3, b3 = params
    batch, input_dim = x.shape
    out_dim = w3.shape[1]

    d_pack, d_tile, d_vmem = _chip_defaults()
    pack = pack or d_pack
    tile_b = tile_b or d_tile
    vmem_limit_bytes = vmem_limit_bytes or d_vmem

    # Packed x last dim (pack*input_dim) must be a lane multiple (128) so the
    # input DMA / VMEM tile are dense.  pack <= 128 always terminates.
    while (pack * input_dim) % 128 != 0:
        pack *= 2
    # TODO(synk): for tiny/odd feature dims pack can reach 128 and inflate the
    # block-diagonal weights; fall back to an unpacked (B, input_dim) layout then.

    # Pad only the ragged tail (< pack rows); no-op for aligned batches.
    b_pad = _round_up(batch, pack)
    if b_pad != batch:
        x = jnp.pad(x, ((0, b_pad - batch), (0, 0)))
    rows = b_pad // pack
    xp = x.reshape(rows, pack * input_dim)         # free contiguous view, still f32

    # Block-diagonal packed weights / tiled biases (tiny, VMEM-resident).
    cd = compute_dtype
    eye = jnp.eye(pack, dtype=cd)
    w1p = jnp.kron(eye, w1.astype(cd))
    w2p = jnp.kron(eye, w2.astype(cd))
    w3p = jnp.kron(eye, w3.astype(cd))
    b1p = jnp.tile(b1, (1, pack))
    b2p = jnp.tile(b2, (1, pack))
    b3p = jnp.tile(b3, (1, pack))

    # Batch tile in packed rows: multiple of 8, or the whole array.
    bm = max(8, (tile_b // pack // 8) * 8)
    if bm >= rows:
        bm = rows
    num_blocks = pl.cdiv(rows, bm)   # last block may be partial; OOB writes are masked

    def resident(shape):
        # Constant block index across the grid -> stays in VMEM, no re-DMA.
        return pl.BlockSpec(shape, lambda i: (0,) * len(shape))

    out_p = pl.pallas_call(
        mlp_kernel,
        out_shape=jax.ShapeDtypeStruct((rows, pack * out_dim), jnp.float32),
        grid=(num_blocks,),
        in_specs=[
            pl.BlockSpec((bm, pack * input_dim), lambda i: (i, 0)),
            resident(w1p.shape), resident(b1p.shape),
            resident(w2p.shape), resident(b2p.shape),
            resident(w3p.shape), resident(b3p.shape),
        ],
        out_specs=pl.BlockSpec((bm, pack * out_dim), lambda i: (i, 0)),
        compiler_params=pltpu.CompilerParams(
            dimension_semantics=("parallel",),
            vmem_limit_bytes=vmem_limit_bytes,
        ),
    )(xp, w1p, b1p, w2p, b2p, w3p, b3p)

    out = out_p.reshape(b_pad, out_dim)            # free contiguous view
    return out if b_pad == batch else out[:batch]


def init_params(key, input_dim, output_dim):
    # Deterministic synthetic init (PyTorch-like uniform fan-in scaling).
    dims = [(input_dim, 16), (16, 8), (8, output_dim)]
    params = []
    for fan_in, fan_out in dims:
        key, kw, kb = jax.random.split(key, 3)
        bound = 1.0 / jnp.sqrt(fan_in)
        w = jax.random.uniform(kw, (fan_in, fan_out), jnp.float32, -bound, bound)
        b = jax.random.uniform(kb, (1, fan_out), jnp.float32, -bound, bound)
        params += [w, b]
    return params


def reference_forward(x, params, compute_dtype=jnp.float32):
    # Pure-JAX reference with the same precision recipe as the kernel
    # (operands cast to compute_dtype, f32 accumulation, f32 bias/relu).
    w1, b1, w2, b2, w3, b3 = params
    cd = compute_dtype
    h1 = jnp.dot(x.astype(cd), w1.astype(cd),
                 preferred_element_type=jnp.float32) + b1
    h1 = jnp.maximum(h1, 0.0)
    h2 = jnp.dot(h1.astype(cd), w2.astype(cd),
                 preferred_element_type=jnp.float32) + b2
    h2 = jnp.maximum(h2, 0.0)
    return jnp.dot(h2.astype(cd), w3.astype(cd),
                   preferred_element_type=jnp.float32) + b3


if __name__ == "__main__":
    input_dim, output_dim = 32, 4

    key = jax.random.PRNGKey(0)
    key, kx = jax.random.split(key)
    params = init_params(key, input_dim, output_dim)

    # Test 1: small ragged batch (not a multiple of the packing factor).
    batch = 100
    x = jax.random.normal(kx, (batch, input_dim), jnp.float32)
    y = mlp_forward(x, params)
    jax.block_until_ready(y)
    assert y.shape == (batch, output_dim)
    y_ref_bf16 = reference_forward(x, params, compute_dtype=jnp.bfloat16)
    y_ref_f32 = reference_forward(x, params, compute_dtype=jnp.float32)
    assert jnp.allclose(y, y_ref_bf16, atol=2e-3, rtol=2e-3)
    assert jnp.allclose(y, y_ref_f32, atol=5e-2, rtol=5e-2)

    # Test 2: multi-step grid (4 evenly divided tiles) with resident packed weights.
    batch2 = 4096
    key, kx2 = jax.random.split(key)
    x2 = jax.random.normal(kx2, (batch2, input_dim), jnp.float32)
    y2 = mlp_forward(x2, params, pack=16, tile_b=1024)
    jax.block_until_ready(y2)
    assert y2.shape == (batch2, output_dim)
    y2_ref = reference_forward(x2, params, compute_dtype=jnp.bfloat16)
    assert jnp.allclose(y2, y2_ref, atol=2e-3, rtol=2e-3)

    # Test 3: ragged batch AND a partial last grid block (OOB writes masked).
    batch3 = 1000
    key, kx3 = jax.random.split(key)
    x3 = jax.random.normal(kx3, (batch3, input_dim), jnp.float32)
    y3 = mlp_forward(x3, params, pack=16, tile_b=512)
    jax.block_until_ready(y3)
    assert y3.shape == (batch3, output_dim)
    y3_ref = reference_forward(x3, params, compute_dtype=jnp.bfloat16)
    assert jnp.allclose(y3, y3_ref, atol=2e-3, rtol=2e-3)

    print("KERNEL_OK")
</pallas_src>

<mosaic_0001>
module attributes {stable_mosaic.version = 11 : i64} {
  func.func @mlp_kernel(%arg0: i32, %arg1: memref<7x512xf32, #tpu.memory_space<vmem>>, %arg2: memref<512x256xbf16, #tpu.memory_space<vmem>>, %arg3: memref<1x256xf32, #tpu.memory_space<vmem>>, %arg4: memref<256x128xbf16, #tpu.memory_space<vmem>>, %arg5: memref<1x128xf32, #tpu.memory_space<vmem>>, %arg6: memref<128x64xbf16, #tpu.memory_space<vmem>>, %arg7: memref<1x64xf32, #tpu.memory_space<vmem>>, %arg8: memref<7x64xf32, #tpu.memory_space<vmem>>) attributes {dimension_semantics = [#tpu.dimension_semantics<parallel>], iteration_bounds = array<i64: 1>, scalar_prefetch = 0 : i64, scratch_operands = 0 : i64, tpu.core_type = #tpu.core_type<tc>, window_params = [{transform_indices = @transform_0, window_bounds = array<i64: 7, 512>}, {pipeline_mode = #tpu.pipeline_mode<synchronous>, transform_indices = @transform_1, window_bounds = array<i64: 512, 256>}, {pipeline_mode = #tpu.pipeline_mode<synchronous>, transform_indices = @transform_2, window_bounds = array<i64: 1, 256>}, {pipeline_mode = #tpu.pipeline_mode<synchronous>, transform_indices = @transform_3, window_bounds = array<i64: 256, 128>}, {pipeline_mode = #tpu.pipeline_mode<synchronous>, transform_indices = @transform_4, window_bounds = array<i64: 1, 128>}, {pipeline_mode = #tpu.pipeline_mode<synchronous>, transform_indices = @transform_5, window_bounds = array<i64: 128, 64>}, {pipeline_mode = #tpu.pipeline_mode<synchronous>, transform_indices = @transform_6, window_bounds = array<i64: 1, 64>}, {transform_indices = @transform_7, window_bounds = array<i64: 7, 64>}]} {
    %c0 = arith.constant 0 : index
    %c0_0 = arith.constant 0 : index
    %0 = vector.load %arg1[%c0, %c0_0] : memref<7x512xf32, #tpu.memory_space<vmem>>, vector<7x512xf32>
    %1 = arith.truncf %0 : vector<7x512xf32> to vector<7x512xbf16>
    %c0_1 = arith.constant 0 : index
    %c0_2 = arith.constant 0 : index
    %2 = vector.load %arg2[%c0_1, %c0_2] : memref<512x256xbf16, #tpu.memory_space<vmem>>, vector<512x256xbf16>
    %cst = arith.constant dense<0.000000e+00> : vector<7x256xf32>
    %3 = tpu.matmul %1, %2, %cst {dimension_numbers = #tpu.dot_dimension_numbers<[1], [0], [0], [1], [0, 0, 1, 1], [], []>} : vector<7x512xbf16>, vector<512x256xbf16>, vector<7x256xf32> -> vector<7x256xf32>
    %c0_3 = arith.constant 0 : index
    %c0_4 = arith.constant 0 : index
    %4 = vector.load %arg3[%c0_3, %c0_4] : memref<1x256xf32, #tpu.memory_space<vmem>>, vector<1x256xf32>
    %5 = vector.broadcast %4 : vector<1x256xf32> to vector<7x256xf32>
    %6 = arith.addf %3, %5 : vector<7x256xf32>
    %cst_5 = arith.constant 0.000000e+00 : f32
    %7 = vector.broadcast %cst_5 : f32 to vector<7x256xf32>
    %8 = arith.maximumf %6, %7 : vector<7x256xf32>
    %9 = arith.truncf %8 : vector<7x256xf32> to vector<7x256xbf16>
    %c0_6 = arith.constant 0 : index
    %c0_7 = arith.constant 0 : index
    %10 = vector.load %arg4[%c0_6, %c0_7] : memref<256x128xbf16, #tpu.memory_space<vmem>>, vector<256x128xbf16>
    %cst_8 = arith.constant dense<0.000000e+00> : vector<7x128xf32>
    %11 = tpu.matmul %9, %10, %cst_8 {dimension_numbers = #tpu.dot_dimension_numbers<[1], [0], [0], [1], [0, 0, 1, 1], [], []>} : vector<7x256xbf16>, vector<256x128xbf16>, vector<7x128xf32> -> vector<7x128xf32>
    %c0_9 = arith.constant 0 : index
    %c0_10 = arith.constant 0 : index
    %12 = vector.load %arg5[%c0_9, %c0_10] : memref<1x128xf32, #tpu.memory_space<vmem>>, vector<1x128xf32>
    %13 = vector.broadcast %12 : vector<1x128xf32> to vector<7x128xf32>
    %14 = arith.addf %11, %13 : vector<7x128xf32>
    %cst_11 = arith.constant 0.000000e+00 : f32
    %15 = vector.broadcast %cst_11 : f32 to vector<7x128xf32>
    %16 = arith.maximumf %14, %15 : vector<7x128xf32>
    %17 = arith.truncf %16 : vector<7x128xf32> to vector<7x128xbf16>
    %c0_12 = arith.constant 0 : index
    %c0_13 = arith.constant 0 : index
    %18 = vector.load %arg6[%c0_12, %c0_13] : memref<128x64xbf16, #tpu.memory_space<vmem>>, vector<128x64xbf16>
    %cst_14 = arith.constant dense<0.000000e+00> : vector<7x64xf32>
    %19 = tpu.matmul %17, %18, %cst_14 {dimension_numbers = #tpu.dot_dimension_numbers<[1], [0], [0], [1], [0, 0, 1, 1], [], []>} : vector<7x128xbf16>, vector<128x64xbf16>, vector<7x64xf32> -> vector<7x64xf32>
    %c0_15 = arith.constant 0 : index
    %c0_16 = arith.constant 0 : index
    %20 = vector.load %arg7[%c0_15, %c0_16] : memref<1x64xf32, #tpu.memory_space<vmem>>, vector<1x64xf32>
    %21 = vector.broadcast %20 : vector<1x64xf32> to vector<7x64xf32>
    %22 = arith.addf %19, %21 : vector<7x64xf32>
    %c0_17 = arith.constant 0 : index
    %c0_18 = arith.constant 0 : index
    %23 = vector.load %arg8[%c0_17, %c0_18] : memref<7x64xf32, #tpu.memory_space<vmem>>, vector<7x64xf32>
    tpu.vector_store %arg8[%c0_17, %c0_18], %22 {strides = array<i32>} : memref<7x64xf32, #tpu.memory_space<vmem>>, vector<7x64xf32>,
    return
  }
  func.func @transform_0(%arg0: i32) -> (i32, i32) {
    %c0_i32 = arith.constant 0 : i32
    %c0_i32_0 = arith.constant 0 : i32
    return %arg0, %c0_i32 : i32, i32
  }
  func.func @transform_1(%arg0: i32) -> (i32, i32) {
    %c0_i32 = arith.constant 0 : i32
    %c0_i32_0 = arith.constant 0 : i32
    %c0_i32_1 = arith.constant 0 : i32
    return %c0_i32, %c0_i32_0 : i32, i32
  }
  func.func @transform_2(%arg0: i32) -> (i32, i32) {
    %c0_i32 = arith.constant 0 : i32
    %c0_i32_0 = arith.constant 0 : i32
    %c0_i32_1 = arith.constant 0 : i32
    return %c0_i32, %c0_i32_0 : i32, i32
  }
  func.func @transform_3(%arg0: i32) -> (i32, i32) {
    %c0_i32 = arith.constant 0 : i32
    %c0_i32_0 = arith.constant 0 : i32
    %c0_i32_1 = arith.constant 0 : i32
    return %c0_i32, %c0_i32_0 : i32, i32
  }
  func.func @transform_4(%arg0: i32) -> (i32, i32) {
    %c0_i32 = arith.constant 0 : i32
    %c0_i32_0 = arith.constant 0 : i32
    %c0_i32_1 = arith.constant 0 : i32
    return %c0_i32, %c0_i32_0 : i32, i32
  }
  func.func @transform_5(%arg0: i32) -> (i32, i32) {
    %c0_i32 = arith.constant 0 : i32
    %c0_i32_0 = arith.constant 0 : i32
    %c0_i32_1 = arith.constant 0 : i32
    return %c0_i32, %c0_i32_0 : i32, i32
  }
  func.func @transform_6(%arg0: i32) -> (i32, i32) {
    %c0_i32 = arith.constant 0 : i32
    %c0_i32_0 = arith.constant 0 : i32
    %c0_i32_1 = arith.constant 0 : i32
    return %c0_i32, %c0_i32_0 : i32, i32
  }
  func.func @transform_7(%arg0: i32) -> (i32, i32) {
    %c0_i32 = arith.constant 0 : i32
    %c0_i32_0 = arith.constant 0 : i32
    return %arg0, %c0_i32 : i32, i32
  }
}

</mosaic_0001>

<bundles_post_ra>
// kernel: tpu_custom_call.1
= control target key start
LH: loop header
LB: loop body
LE: loop exit
PB: predicated region body
PF: predicated region fallthrough
CT: control target
= control target key end

     0   :  { %12 = vsyncpa [#allocation3], 0  ;;  %s1470_s0 = inlined_call_operand.vmem [shape: f32[7,512], index: 0, kind: input, shape index: {}]   ;;  %s1471_s1 = inlined_call_operand.hbm [shape: bf16[512,256], index: 1, kind: input, shape index: {}]   ;;  %s1472_s2 = inlined_call_operand.vmem [shape: f32[1,256], index: 2, kind: input, shape index: {}]   ;;  %s1473_s3 = inlined_call_operand.hbm [shape: bf16[256,128], index: 3, kind: input, shape index: {}]   ;;  %s1474_s4 = inlined_call_operand.vmem [shape: f32[1,128], index: 4, kind: input, shape index: {}]   ;;  %s1475_s5 = inlined_call_operand.vmem [shape: bf16[128,64], index: 5, kind: input, shape index: {}]   ;;  %s1476_s6 = inlined_call_operand.vmem [shape: f32[1,64], index: 6, kind: input, shape index: {}]   ;;  %s1477_s7 = inlined_call_operand.hbm [shape: f32[7,64], index: 7, kind: output, shape index: {}]  }
   0x1   :  { %13 = vsyncpa [#allocation6], 0 }
   0x2   :  { %14 = vsyncpa [#allocation4], 0  ;;  %s21_s26 = sshll.u32 %s1471_s1, 4  ;;  %s1353_s27 = smov [#allocation2]   ;;  %s22_s26 = int_to_ptr.hbm [resolvable:$true] %s21_s26 }
   0x3   :  { %s23_s28 = sshll.u32 %s1353_s27, 4  ;;  %s36_s8 = sshll.u32 %s1473_s3, 4  ;;  %s24_s28 = int_to_ptr.vmem [resolvable:$true] %s23_s28  ;;  %s37_s8 = int_to_ptr.hbm [resolvable:$true] %s36_s8 }
   0x4   :  { %s1354_s9 = smov 128   ;;  %s1355_s10 = smov 8  }
   0x5   :  { %29 = dma.hbm_to_vmem [thread:$0]  %s22_s26, 8192, %s24_s28, [#allocation3], %s1354_s9, %s1354_s9, %s1355_s10  }
   0x6   :  { %s1356_s11 = smov [#allocation5]   ;;  %s1357_s13 = smov 64  }
   0x7   :  { %s38_s12 = sshll.u32 %s1356_s11, 4  ;;  %s1358_s14 = smov 4   ;;  %s39_s12 = int_to_ptr.vmem [resolvable:$true] %s38_s12 }
   0x8   :  { %44 = dma.hbm_to_vmem [thread:$0]  %s37_s8, 2048, %s39_s12, [#allocation6], %s1357_s13, %s1357_s13, %s1358_s14  }
   0x9   :  { %1347 = dma.done.wait [#allocation3], 8192  }
   0xa   :  { %1348 = vsyncadd [#allocation3], 4294959104 }
   0xb   :  { %1349 = dma.done.wait [#allocation6], 2048  }
   0xc   :  { %1350 = vsyncadd [#allocation6], 4294965248  ;;  %v884_v0 = vld [vmem:[#allocation2 + $0x70] sm:$0xf]  ;;  %v1193_v1 = vld [vmem:[#allocation2 + $0x74] sm:$0xf0] }
   0xd   :  { %v948_v2 = vld [vmem:[#allocation2 + $0xf0] sm:$0xf]  ;;  %v885_v3 = vor.u32 %v1193_v1, %v884_v0  ;;  %v1209_v4 = vld [vmem:[#allocation2 + $0xf4] sm:$0xf0]  ;;  %v876_v11 = vld [vmem:[#allocation2 + $0x60] sm:$0xf] }
   0xe   :  { %v1012_v5 = vld [vmem:[#allocation2 + $0x170] sm:$0xf]  ;;  %v1225_v6 = vld [vmem:[#allocation2 + $0x174] sm:$0xf0]  ;;  %v949_v7 = vor.u32 %v1209_v4, %v948_v2  ;;  %v1191_v13 = vld [vmem:[#allocation2 + $0x64] sm:$0xf0] }
   0xf   :  { %v1013_v8 = vor.u32 %v1225_v6, %v1012_v5  ;;  %v1076_v9 = vld [vmem:[#allocation2 + $0x1f0] sm:$0xf]  ;;  %v1241_v10 = vld [vmem:[#allocation2 + $0x1f4] sm:$0xf0]  ;;  %457 = vmatpush.bf16.msra.mxu0 %v885_v3  ;;  %v940_v14 = vld [vmem:[#allocation2 + $0xe0] sm:$0xf]  ;;  %v877_v16 = vor.u32 %v1191_v13, %v876_v11 }
  0x10   :  { %v1077_v12 = vor.u32 %v1241_v10, %v1076_v9  ;;  %v1207_v15 = vld [vmem:[#allocation2 + $0xe4] sm:$0xf0]  ;;  %470 = vmatpush.bf16.msra.mxu1 %v949_v7  ;;  %v1004_v18 = vld [vmem:[#allocation2 + $0x160] sm:$0xf]  ;;  %v868_v23 = vld [vmem:[#allocation2 + $0x50] sm:$0xf] }
  0x11   :  { %483 = vmatpush.bf16.msra.mxu2 %v1013_v8  ;;  %v941_v17 = vor.u32 %v1207_v15, %v940_v14  ;;  %v1223_v19 = vld [vmem:[#allocation2 + $0x164] sm:$0xf0]  ;;  %v1068_v20 = vld [vmem:[#allocation2 + $0x1e0] sm:$0xf]  ;;  %v1189_v24 = vld [vmem:[#allocation2 + $0x54] sm:$0xf0] }
  0x12   :  { %496 = vmatpush.bf16.msra.mxu3 %v1077_v12  ;;  %v1005_v21 = vor.u32 %v1223_v19, %v1004_v18  ;;  %v1239_v22 = vld [vmem:[#allocation2 + $0x1e4] sm:$0xf0]  ;;  %v932_v26 = vld [vmem:[#allocation2 + $0xd0] sm:$0xf]  ;;  %v1205_v27 = vld [vmem:[#allocation2 + $0xd4] sm:$0xf0]  ;;  %v869_v29 = vor.u32 %v1189_v24, %v868_v23 }
  0x13   :  { %v1069_v25 = vor.u32 %v1239_v22, %v1068_v20  ;;  %v996_v28 = vld [vmem:[#allocation2 + $0x150] sm:$0xf]  ;;  %458 = vmatpush.bf16.msra.mxu0 %v877_v16  ;;  %v1221_v30 = vld [vmem:[#allocation2 + $0x154] sm:$0xf0]  ;;  %v933_v33 = vor.u32 %v1205_v27, %v932_v26  ;;  %v860_v35 = vld [vmem:[#allocation2 + $0x40] sm:$0xf] }
  0x14   :  { %v1060_v31 = vld [vmem:[#allocation2 + $0x1d0] sm:$0xf]  ;;  %v1237_v32 = vld [vmem:[#allocation2 + $0x1d4] sm:$0xf0]  ;;  %471 = vmatpush.bf16.msra.mxu1 %v941_v17  ;;  %v997_v34 = vor.u32 %v1221_v30, %v996_v28  ;;  %v1187_v36 = vld [vmem:[#allocation2 + $0x44] sm:$0xf0] }
  0x15   :  { %484 = vmatpush.bf16.msra.mxu2 %v1005_v21  ;;  %v924_v37 = vld [vmem:[#allocation2 + $0xc0] sm:$0xf]  ;;  %v1061_v38 = vor.u32 %v1237_v32, %v1060_v31  ;;  %v1203_v39 = vld [vmem:[#allocation2 + $0xc4] sm:$0xf0]  ;;  %v861_v44 = vor.u32 %v1187_v36, %v860_v35  ;;  %v852_v47 = vld [vmem:[#allocation2 + $0x30] sm:$0xf] }
  0x16   :  { %497 = vmatpush.bf16.msra.mxu3 %v1069_v25  ;;  %v988_v40 = vld [vmem:[#allocation2 + $0x140] sm:$0xf]  ;;  %v1219_v41 = vld [vmem:[#allocation2 + $0x144] sm:$0xf0]  ;;  %v925_v45 = vor.u32 %v1203_v39, %v924_v37  ;;  %v1185_v48 = vld [vmem:[#allocation2 + $0x34] sm:$0xf0] }
  0x17   :  { %v1052_v42 = vld [vmem:[#allocation2 + $0x1c0] sm:$0xf]  ;;  %v1235_v43 = vld [vmem:[#allocation2 + $0x1c4] sm:$0xf0]  ;;  %459 = vmatpush.bf16.msra.mxu0 %v869_v29  ;;  %v989_v46 = vor.u32 %v1219_v41, %v988_v40  ;;  %v916_v49 = vld [vmem:[#allocation2 + $0xb0] sm:$0xf]  ;;  %v853_v56 = vor.u32 %v1185_v48, %v852_v47 }
  0x18   :  { %472 = vmatpush.bf16.msra.mxu1 %v933_v33  ;;  %v1053_v50 = vor.u32 %v1235_v43, %v1052_v42  ;;  %v1201_v51 = vld [vmem:[#allocation2 + $0xb4] sm:$0xf0]  ;;  %v980_v52 = vld [vmem:[#allocation2 + $0x130] sm:$0xf]  ;;  %v844_v59 = vld [vmem:[#allocation2 + $0x20] sm:$0xf] }
  0x19   :  { %485 = vmatpush.bf16.msra.mxu2 %v997_v34  ;;  %v1217_v53 = vld [vmem:[#allocation2 + $0x134] sm:$0xf0]  ;;  %v1044_v54 = vld [vmem:[#allocation2 + $0x1b0] sm:$0xf]  ;;  %v917_v57 = vor.u32 %v1201_v51, %v916_v49  ;;  %v1183_v60 = vld [vmem:[#allocation2 + $0x24] sm:$0xf0] }
  0x1a   :  { %498 = vmatpush.bf16.msra.mxu3 %v1061_v38  ;;  %v1233_v55 = vld [vmem:[#allocation2 + $0x1b4] sm:$0xf0]  ;;  %v981_v58 = vor.u32 %v1217_v53, %v980_v52  ;;  %v908_v61 = vld [vmem:[#allocation2 + $0xa0] sm:$0xf]  ;;  %v1199_v63 = vld [vmem:[#allocation2 + $0xa4] sm:$0xf0]  ;;  %v845_v4 = vor.u32 %v1183_v60, %v844_v59 }
  0x1b   :  { %460 = vmatpush.bf16.msra.mxu0 %v861_v44  ;;  %v1045_v62 = vor.u32 %v1233_v55, %v1044_v54  ;;  %v972_v0 = vld [vmem:[#allocation2 + $0x120] sm:$0xf]  ;;  %v1215_v1 = vld [vmem:[#allocation2 + $0x124] sm:$0xf0]  ;;  %v909_v5 = vor.u32 %v1199_v63, %v908_v61  ;;  %v836_v7 = vld [vmem:[#allocation2 + $0x10] sm:$0xf] }
  0x1c   :  { %473 = vmatpush.bf16.msra.mxu1 %v925_v45  ;;  %v1036_v2 = vld [vmem:[#allocation2 + $0x1a0] sm:$0xf]  ;;  %v1231_v3 = vld [vmem:[#allocation2 + $0x1a4] sm:$0xf0]  ;;  %v973_v6 = vor.u32 %v1215_v1, %v972_v0  ;;  %v1181_v8 = vld [vmem:[#allocation2 + $0x14] sm:$0xf0] }
  0x1d   :  { %486 = vmatpush.bf16.msra.mxu2 %v989_v46  ;;  %v900_v9 = vld [vmem:[#allocation2 + $0x90] sm:$0xf]  ;;  %v1037_v10 = vor.u32 %v1231_v3, %v1036_v2  ;;  %v1197_v11 = vld [vmem:[#allocation2 + $0x94] sm:$0xf0]  ;;  %v837_v16 = vor.u32 %v1181_v8, %v836_v7  ;;  %v828_v17 = vld [vmem:[#allocation2] sm:$0xf] }
  0x1e   :  { %499 = vmatpush.bf16.msra.mxu3 %v1053_v50  ;;  %v964_v12 = vld [vmem:[#allocation2 + $0x110] sm:$0xf]  ;;  %v1213_v13 = vld [vmem:[#allocation2 + $0x114] sm:$0xf0]  ;;  %v1179_v18 = vld [vmem:[#allocation2 + $0x4] sm:$0xf0]  ;;  %v901_v19 = vor.u32 %v1197_v11, %v900_v9 }
  0x1f   :  { %461 = vmatpush.bf16.msra.mxu0 %v853_v56  ;;  %v1028_v14 = vld [vmem:[#allocation2 + $0x190] sm:$0xf]  ;;  %v1229_v15 = vld [vmem:[#allocation2 + $0x194] sm:$0xf0]  ;;  %v965_v20 = vor.u32 %v1213_v13, %v964_v12  ;;  %v892_v21 = vld [vmem:[#allocation2 + $0x80] sm:$0xf]  ;;  %v829_v31 = vor.u32 %v1179_v18, %v828_v17 }
  0x20   :  { %474 = vmatpush.bf16.msra.mxu1 %v917_v57  ;;  %v1195_v22 = vld [vmem:[#allocation2 + $0x84] sm:$0xf0]  ;;  %v956_v23 = vld [vmem:[#allocation2 + $0x100] sm:$0xf]  ;;  %v1029_v24 = vor.u32 %v1229_v15, %v1028_v14  ;;  %v1192_v28 = vld [vmem:[#allocation2 + $0x74] sm:$0xf] }
  0x21   :  { %487 = vmatpush.bf16.msra.mxu2 %v981_v58  ;;  %v1211_v25 = vld [vmem:[#allocation2 + $0x104] sm:$0xf0]  ;;  %v1020_v26 = vld [vmem:[#allocation2 + $0x180] sm:$0xf]  ;;  %v886_v29 = vld [vmem:[#allocation2 + $0x78] sm:$0xf0]  ;;  %v893_v35 = vor.u32 %v1195_v22, %v892_v21 }
  0x22   :  { %500 = vmatpush.bf16.msra.mxu3 %v1045_v62  ;;  %v1227_v27 = vld [vmem:[#allocation2 + $0x184] sm:$0xf0]  ;;  %v1208_v30 = vld [vmem:[#allocation2 + $0xf4] sm:$0xf]  ;;  %v950_v32 = vld [vmem:[#allocation2 + $0xf8] sm:$0xf0]  ;;  %v957_v36 = vor.u32 %v1211_v25, %v956_v23  ;;  %v889_v41 = vor.u32 %v1192_v28, %v886_v29 }
  0x23   :  { %462 = vmatpush.bf16.msra.mxu0 %v845_v4  ;;  %v1224_v33 = vld [vmem:[#allocation2 + $0x174] sm:$0xf]  ;;  %v1014_v34 = vld [vmem:[#allocation2 + $0x178] sm:$0xf0]  ;;  %v1021_v40 = vor.u32 %v1227_v27, %v1020_v26  ;;  %v1190_v42 = vld [vmem:[#allocation2 + $0x64] sm:$0xf]  ;;  %v953_v45 = vor.u32 %v1208_v30, %v950_v32 }
  0x24   :  { %475 = vmatpush.bf16.msra.mxu1 %v909_v5  ;;  %v1240_v37 = vld [vmem:[#allocation2 + $0x1f4] sm:$0xf]  ;;  %v1078_v38 = vld [vmem:[#allocation2 + $0x1f8] sm:$0xf0]  ;;  %v878_v43 = vld [vmem:[#allocation2 + $0x68] sm:$0xf0]  ;;  %v1017_v46 = vor.u32 %v1224_v33, %v1014_v34 }
  0x25   :  { %488 = vmatpush.bf16.msra.mxu2 %v973_v6  ;;  %v61_v39 = vld [vmem:[%s1470_s0 + $0x10] sm:$0x7f]  ;;  %v59_v44 = vld [vmem:[%s1470_s0] sm:$0x7f]  ;;  %v62_v48 = vld [vmem:[%s1470_s0 + $0x18] sm:$0x7f]  ;;  %v1081_v50 = vor.u32 %v1240_v37, %v1078_v38  ;;  %v881_v59 = vor.u32 %v1190_v42, %v878_v43 }
  0x26   :  { %501 = vmatpush.bf16.msra.mxu3 %v1037_v10  ;;  %v1206_v47 = vld [vmem:[#allocation2 + $0xe4] sm:$0xf]  ;;  %v60_v49 = vld [vmem:[%s1470_s0 + $0x8] sm:$0x7f]  ;;  %v1418_v54 = vpack.c.bf16 %v61_v39, %v61_v39  ;;  %v1420_v57 = vpack.c.bf16 %v59_v44, %v59_v44  ;;  %v1422_v58 = vpack.c.bf16 %v62_v48, %v62_v48  ;;  %v1188_v63 = vld [vmem:[#allocation2 + $0x54] sm:$0xf] }
  0x27   :  { %463 = vmatpush.bf16.msra.mxu0 %v837_v16  ;;  %v942_v51 = vld [vmem:[#allocation2 + $0xe8] sm:$0xf0]  ;;  %v1222_v52 = vld [vmem:[#allocation2 + $0x164] sm:$0xf]  ;;  %v1424_v60 = vpack.c.bf16 %v60_v49, %v60_v49  ;;  %v870_v0 = vld [vmem:[#allocation2 + $0x58] sm:$0xf0] }
  0x28   :  { %476 = vmatpush.bf16.msra.mxu1 %v901_v19  ;;  %v1006_v53 = vld [vmem:[#allocation2 + $0x168] sm:$0xf0]  ;;  %v1238_v55 = vld [vmem:[#allocation2 + $0x1e4] sm:$0xf]  ;;  %v945_v61 = vor.u32 %v1206_v47, %v942_v51  ;;  %v1204_v1 = vld [vmem:[#allocation2 + $0xd4] sm:$0xf]  ;;  %v873_v8 = vor.u32 %v1188_v63, %v870_v0 }
  0x29   :  { %489 = vmatpush.bf16.msra.mxu2 %v965_v20  ;;  %v1070_v56 = vld [vmem:[#allocation2 + $0x1e8] sm:$0xf0]  ;;  %v1009_v62 = vor.u32 %v1222_v52, %v1006_v53  ;;  %v934_v3 = vld [vmem:[#allocation2 + $0xd8] sm:$0xf0]  ;;  %v1220_v4 = vld [vmem:[#allocation2 + $0x154] sm:$0xf] }
  0x2a   :  { %502 = vmatpush.bf16.msra.mxu3 %v1029_v24  ;;  %v1073_v2 = vor.u32 %v1238_v55, %v1070_v56  ;;  %v998_v5 = vld [vmem:[#allocation2 + $0x158] sm:$0xf0]  ;;  %v1236_v6 = vld [vmem:[#allocation2 + $0x1d4] sm:$0xf]  ;;  %v937_v9 = vor.u32 %v1204_v1, %v934_v3  ;;  %v1186_v11 = vld [vmem:[#allocation2 + $0x44] sm:$0xf] }
  0x2b   :  { %464 = vmatpush.bf16.msra.mxu0 %v829_v31  ;;  %v1062_v7 = vld [vmem:[#allocation2 + $0x1d8] sm:$0xf0]  ;;  %v1001_v10 = vor.u32 %v1220_v4, %v998_v5  ;;  %v862_v12 = vld [vmem:[#allocation2 + $0x48] sm:$0xf0]  ;;  %v1202_v13 = vld [vmem:[#allocation2 + $0xc4] sm:$0xf] }
  0x2c   :  { %477 = vmatpush.bf16.msra.mxu1 %v893_v35  ;;  %v1065_v14 = vor.u32 %v1236_v6, %v1062_v7  ;;  %v926_v15 = vld [vmem:[#allocation2 + $0xc8] sm:$0xf0]  ;;  %v1218_v16 = vld [vmem:[#allocation2 + $0x144] sm:$0xf]  ;;  %v865_v20 = vor.u32 %v1186_v11, %v862_v12  ;;  %v1184_v23 = vld [vmem:[#allocation2 + $0x34] sm:$0xf] }
  0x2d   :  { %490 = vmatpush.bf16.msra.mxu2 %v957_v36  ;;  %v990_v17 = vld [vmem:[#allocation2 + $0x148] sm:$0xf0]  ;;  %v1234_v18 = vld [vmem:[#allocation2 + $0x1c4] sm:$0xf]  ;;  %v929_v21 = vor.u32 %v1202_v13, %v926_v15  ;;  %v854_v24 = vld [vmem:[#allocation2 + $0x38] sm:$0xf0] }
  0x2e   :  { %503 = vmatpush.bf16.msra.mxu3 %v1021_v40  ;;  %465 = vmatmul.bf16.vlgmr.msra.gmra.mxu0 %v1420_v57  ;;  %v1054_v19 = vld [vmem:[#allocation2 + $0x1c8] sm:$0xf0]  ;;  %v993_v22 = vor.u32 %v1218_v16, %v990_v17  ;;  %v1200_v25 = vld [vmem:[#allocation2 + $0xb4] sm:$0xf]  ;;  %v918_v27 = vld [vmem:[#allocation2 + $0xb8] sm:$0xf0]  ;;  %v857_v32 = vor.u32 %v1184_v23, %v854_v24 }
  0x2f   :  { %509 = vmatpush.bf16.msrb.mxu0 %v889_v41  ;;  %478 = vmatmul.bf16.vlgmr.msra.gmra.mxu1 %v1424_v60  ;;  %v1057_v26 = vor.u32 %v1234_v18, %v1054_v19  ;;  %v1216_v28 = vld [vmem:[#allocation2 + $0x134] sm:$0xf]  ;;  %v982_v29 = vld [vmem:[#allocation2 + $0x138] sm:$0xf0]  ;;  %v1182_v33 = vld [vmem:[#allocation2 + $0x24] sm:$0xf]  ;;  %v921_v34 = vor.u32 %v1200_v25, %v918_v27 }
  0x30   :  { %522 = vmatpush.bf16.msrb.mxu1 %v953_v45  ;;  %491 = vmatmul.bf16.vlgmr.msra.gmra.mxu2 %v1418_v54  ;;  %v1232_v30 = vld [vmem:[#allocation2 + $0x1b4] sm:$0xf]  ;;  %v1046_v31 = vld [vmem:[#allocation2 + $0x1b8] sm:$0xf0]  ;;  %v985_v35 = vor.u32 %v1216_v28, %v982_v29  ;;  %v846_v36 = vld [vmem:[#allocation2 + $0x28] sm:$0xf0] }
  0x31   :  { %535 = vmatpush.bf16.msrb.mxu2 %v1017_v46  ;;  %504 = vmatmul.bf16.vlgmr.msra.gmra.mxu3 %v1422_v58  ;;  %v1198_v37 = vld [vmem:[#allocation2 + $0xa4] sm:$0xf]  ;;  %v1049_v38 = vor.u32 %v1232_v30, %v1046_v31  ;;  %v910_v39 = vld [vmem:[#allocation2 + $0xa8] sm:$0xf0]  ;;  %v849_v44 = vor.u32 %v1182_v33, %v846_v36  ;;  %v1180_v47 = vld [vmem:[#allocation2 + $0x14] sm:$0xf] }
  0x32   :  { %548 = vmatpush.bf16.msrb.mxu3 %v1081_v50  ;;  %v1214_v40 = vld [vmem:[#allocation2 + $0x124] sm:$0xf]  ;;  %v974_v41 = vld [vmem:[#allocation2 + $0x128] sm:$0xf0]  ;;  %v913_v45 = vor.u32 %v1198_v37, %v910_v39  ;;  %v838_v48 = vld [vmem:[#allocation2 + $0x18] sm:$0xf0] }
  0x33   :  { %510 = vmatpush.bf16.msrb.mxu0 %v881_v59  ;;  %v1230_v42 = vld [vmem:[#allocation2 + $0x1a4] sm:$0xf]  ;;  %v1038_v43 = vld [vmem:[#allocation2 + $0x1a8] sm:$0xf0]  ;;  %v977_v46 = vor.u32 %v1214_v40, %v974_v41  ;;  %v1196_v49 = vld [vmem:[#allocation2 + $0x94] sm:$0xf]  ;;  %v841_v59 = vor.u32 %v1180_v47, %v838_v48 }
  0x34   :  { %523 = vmatpush.bf16.msrb.mxu1 %v945_v61  ;;  %v1041_v50 = vor.u32 %v1230_v42, %v1038_v43  ;;  %v902_v51 = vld [vmem:[#allocation2 + $0x98] sm:$0xf0]  ;;  %v1212_v52 = vld [vmem:[#allocation2 + $0x114] sm:$0xf]  ;;  %v1178_v63 = vld [vmem:[#allocation2 + $0x4] sm:$0xf] }
  0x35   :  { %536 = vmatpush.bf16.msrb.mxu2 %v1009_v62  ;;  %v966_v53 = vld [vmem:[#allocation2 + $0x118] sm:$0xf0]  ;;  %v1228_v55 = vld [vmem:[#allocation2 + $0x194] sm:$0xf]  ;;  %v905_v61 = vor.u32 %v1196_v49, %v902_v51  ;;  %v830_v0 = vld [vmem:[#allocation2 + $0x8] sm:$0xf0] }
  0x36   :  { %549 = vmatpush.bf16.msrb.mxu3 %v1073_v2  ;;  %v1030_v56 = vld [vmem:[#allocation2 + $0x198] sm:$0xf0]  ;;  %v969_v62 = vor.u32 %v1212_v52, %v966_v53  ;;  %v1194_v1 = vld [vmem:[#allocation2 + $0x84] sm:$0xf]  ;;  %v894_v3 = vld [vmem:[#allocation2 + $0x88] sm:$0xf0] }
  0x37   :  { %511 = vmatpush.bf16.msrb.mxu0 %v873_v8  ;;  %v1033_v2 = vor.u32 %v1228_v55, %v1030_v56  ;;  %v1210_v4 = vld [vmem:[#allocation2 + $0x104] sm:$0xf]  ;;  %v958_v5 = vld [vmem:[#allocation2 + $0x108] sm:$0xf0]  ;;  %v833_v8 = vor.u32 %v1178_v63, %v830_v0  ;;  %v1249_v12 = vld [vmem:[#allocation5 + $0x38] sm:$0xff]  ;;  %s1359_s16 = smov [#allocation7]  }
  0x38   :  { %524 = vmatpush.bf16.msrb.mxu1 %v937_v9  ;;  %v1226_v6 = vld [vmem:[#allocation2 + $0x184] sm:$0xf]  ;;  %v1022_v7 = vld [vmem:[#allocation2 + $0x188] sm:$0xf0]  ;;  %v897_v9 = vor.u32 %v1194_v1, %v894_v3  ;;  %v1248_v13 = vld [vmem:[#allocation5 + $0x30] sm:$0xff]  ;;  %s813_s17 = sshll.u32 %s1359_s16, 4  ;;  %s814_s17 = int_to_ptr.vmem [resolvable:$true] %s813_s17 }
  0x39   :  { %537 = vmatpush.bf16.msrb.mxu2 %v1001_v10  ;;  %v961_v10 = vor.u32 %v1210_v4, %v958_v5  ;;  %v1025_v11 = vor.u32 %v1226_v6, %v1022_v7  ;;  %v1246_v15 = vld [vmem:[#allocation5 + $0x20] sm:$0xff]  ;;  %v1245_v16 = vld [vmem:[#allocation5 + $0x18] sm:$0xff]  ;;  %v1244_v17 = vld [vmem:[#allocation5 + $0x10] sm:$0xff]  ;;  %s815_s19 = sshll.u32 %s1477_s7, 4  ;;  %vm806_vm0 = vcmask 522240   ;;  %s816_s19 = int_to_ptr.hbm [resolvable:$true] %s815_s19 }
  0x3a   :  { %550 = vmatpush.bf16.msrb.mxu3 %v1065_v14  ;;  %v1247_v14 = vld [vmem:[#allocation5 + $0x28] sm:$0xff]  ;;  %v1257_v19 = vld [vmem:[#allocation5 + $0x78] sm:$0xff]  ;;  %v1252_v23 = vld [vmem:[#allocation5 + $0x50] sm:$0xff] }
  0x3b   :  { %512 = vmatpush.bf16.msrb.mxu0 %v865_v20  ;;  %v1243_v18 = vld [vmem:[#allocation5 + $0x8] sm:$0xff]  ;;  %v1256_v20 = vld [vmem:[#allocation5 + $0x70] sm:$0xff]  ;;  %v1265_v56 = vld [vmem:[%s1475_s5 + $0x38] sm:$0xff] }
  0x3c   :  { %525 = vmatpush.bf16.msrb.mxu1 %v929_v21  ;;  %v1253_v21 = vld [vmem:[#allocation5 + $0x58] sm:$0xff]  ;;  %v1251_v28 = vld [vmem:[#allocation5 + $0x48] sm:$0xff]  ;;  %v1260_v0 = vld [vmem:[%s1475_s5 + $0x10] sm:$0xff] }
  0x3d   :  { %538 = vmatpush.bf16.msrb.mxu2 %v993_v22  ;;  %v1261_v63 = vld [vmem:[%s1475_s5 + $0x18] sm:$0xff]  ;;  %v1259_v1 = vld [vmem:[%s1475_s5 + $0x8] sm:$0xff]  ;;  %v1258_v3 = vld [vmem:[%s1475_s5] sm:$0xff] }
  0x3e   :  { %551 = vmatpush.bf16.msrb.mxu3 %v1057_v26  ;;  %v1273_v5 = vld [vmem:[%s1474_s4] ss:$0 sm:$0xff] }
  0x3f   :  { %513 = vmatpush.bf16.msrb.mxu0 %v857_v32 }
  0x40   :  { %526 = vmatpush.bf16.msrb.mxu1 %v921_v34  ;;  %v1250_v34 = vld [vmem:[#allocation5 + $0x40] sm:$0xff] }
  0x41   :  { %539 = vmatpush.bf16.msrb.mxu2 %v985_v35 }
  0x42   :  { %552 = vmatpush.bf16.msrb.mxu3 %v1049_v38 }
  0x43   :  { %514 = vmatpush.bf16.msrb.mxu0 %v849_v44 }
  0x44   :  { %527 = vmatpush.bf16.msrb.mxu1 %v913_v45 }
  0x45   :  { %540 = vmatpush.bf16.msrb.mxu2 %v977_v46 }
  0x46   :  { %553 = vmatpush.bf16.msrb.mxu3 %v1041_v50 }
  0x47   :  { %515 = vmatpush.bf16.msrb.mxu0 %v841_v59  ;;  %v1264_v59 = vld [vmem:[%s1475_s5 + $0x30] sm:$0xff] }
  0x48   :  { %528 = vmatpush.bf16.msrb.mxu1 %v905_v61  ;;  %v1263_v61 = vld [vmem:[%s1475_s5 + $0x28] sm:$0xff] }
  0x49   :  { %541 = vmatpush.bf16.msrb.mxu2 %v969_v62  ;;  %v1262_v62 = vld [vmem:[%s1475_s5 + $0x20] sm:$0xff] }
  0x4a   :  { %554 = vmatpush.bf16.msrb.mxu3 %v1033_v2 }
  0x4b   :  { %516 = vmatpush.bf16.msrb.mxu0 %v833_v8 }
  0x4c   :  { %529 = vmatpush.bf16.msrb.mxu1 %v897_v9 }
  0x4d   :  { %542 = vmatpush.bf16.msrb.mxu2 %v961_v10 }
  0x4e   :  { %555 = vmatpush.bf16.msrb.mxu3 %v1025_v11  ;;  %517 = vmatmul.bf16.vlgmr.msrb.gmra.mxu0 %v1420_v57  ;;  %v1242_v57 = vld [vmem:[#allocation5] sm:$0xff] }
  0x4f   :  { %697 = vmatpush.bf16.msra.mxu0 %v1249_v12  ;;  %530 = vmatmul.bf16.vlgmr.msrb.gmra.mxu1 %v1424_v60  ;;  %v131_v60 = vld [vmem:[%s1472_s2] sm:$0x3] }
  0x50   :  { %543 = vmatmul.bf16.vlgmr.msrb.gmra.mxu2 %v1418_v54  ;;  %710 = vmatpush.bf16.msra.mxu1 %v1257_v19  ;;  %v1255_v54 = vld [vmem:[#allocation5 + $0x68] sm:$0xff]  ;;  %v133_v22 = vperm.slane %v131_v60, 0  ;;  %v134_v40 = vperm.slane %v131_v60, 1  ;;  %v1274_v12 = vld [vmem:[%s1476_s6] ss:$0 sm:$0xff] }
  0x51   :  { %556 = vmatmul.bf16.vlgmr.msrb.gmra.mxu3 %v1422_v58  ;;  %v1254_v58 = vld [vmem:[#allocation5 + $0x60] sm:$0xff]  ;;  %793 = vmatpush.bf16.msra.mxu2 %v1265_v56 }
  0x53   :  { %698 = vmatpush.bf16.msra.mxu0 %v1248_v13 }
  0x54   :  { %711 = vmatpush.bf16.msra.mxu1 %v1256_v20 }
  0x55   :  { %794 = vmatpush.bf16.msra.mxu2 %v1264_v59 }
  0x57   :  { %699 = vmatpush.bf16.msra.mxu0 %v1247_v14 }
  0x58   :  { %712 = vmatpush.bf16.msra.mxu1 %v1255_v54 }
  0x59   :  { %795 = vmatpush.bf16.msra.mxu2 %v1263_v61 }
  0x5b   :  { %700 = vmatpush.bf16.msra.mxu0 %v1246_v15 }
  0x5c   :  { %713 = vmatpush.bf16.msra.mxu1 %v1254_v58 }
  0x5d   :  { %796 = vmatpush.bf16.msra.mxu2 %v1262_v62 }
  0x5f   :  { %701 = vmatpush.bf16.msra.mxu0 %v1245_v16 }
  0x60   :  { %714 = vmatpush.bf16.msra.mxu1 %v1253_v21 }
  0x61   :  { %797 = vmatpush.bf16.msra.mxu2 %v1261_v63 }
  0x63   :  { %702 = vmatpush.bf16.msra.mxu0 %v1244_v17 }
  0x64   :  { %715 = vmatpush.bf16.msra.mxu1 %v1252_v23 }
  0x65   :  { %798 = vmatpush.bf16.msra.mxu2 %v1260_v0 }
  0x67   :  { %703 = vmatpush.bf16.msra.mxu0 %v1243_v18 }
  0x68   :  { %716 = vmatpush.bf16.msra.mxu1 %v1251_v28 }
  0x69   :  { %799 = vmatpush.bf16.msra.mxu2 %v1259_v1 }
  0x6b   :  { %704 = vmatpush.bf16.msra.mxu0 %v1242_v57 }
  0x6c   :  { %717 = vmatpush.bf16.msra.mxu1 %v1250_v34 }
  0x6d   :  { %800 = vmatpush.bf16.msra.mxu2 %v1258_v3 }
  0xab   :  { %v466_v24 = vpop.f32.mrf.mxu0 }
  0xac   :  { %v467_v25 = vadd.f32 %v466_v24, %v133_v22  ;;  %v479_v26 = vpop.f32.mrf.mxu1 }
  0xae   :  { %v480_v27 = vadd.f32 %v479_v26, %v467_v25 }
  0xb3   :  { %v492_v29 = vpop.f32.mrf.mxu2  ;;  %v468_v33 = vpop.f32.mrf.mxu0 }
  0xb4   :  { %v493_v30 = vadd.f32 %v492_v29, %v480_v27  ;;  %v505_v31 = vpop.f32.mrf.mxu3  ;;  %v481_v35 = vpop.f32.mrf.mxu1 }
  0xb6   :  { %v506_v32 = vadd.f32 %v505_v31, %v493_v30 }
  0xb8   :  { %v561_v36 = vmax.f32 %v506_v32, 0.0 }
  0xba   :  { %v563_v37 = vpack.c.bf16 %v561_v36, %v561_v36 }
  0xbb   :  { %v494_v38 = vpop.f32.mrf.mxu2 }
  0xbc   :  { %705 = vmatmul.bf16.vlgmr.msra.gmra.mxu0 %v563_v37  ;;  %v507_v39 = vpop.f32.mrf.mxu3 }
  0xcb   :  { %v518_v41 = vpop.f32.mrf.mxu0 }
  0xcc   :  { %v519_v42 = vadd.f32 %v518_v41, %v134_v40  ;;  %v531_v43 = vpop.f32.mrf.mxu1 }
  0xce   :  { %v532_v44 = vadd.f32 %v531_v43, %v519_v42 }
  0xd3   :  { %v544_v45 = vpop.f32.mrf.mxu2  ;;  %v520_v48 = vpop.f32.mrf.mxu0 }
  0xd4   :  { %v545_v46 = vadd.f32 %v544_v45, %v532_v44  ;;  %v557_v47 = vpop.f32.mrf.mxu3  ;;  %v533_v49 = vpop.f32.mrf.mxu1 }
  0xd6   :  { %v558_v50 = vadd.f32 %v557_v47, %v545_v46 }
  0xd8   :  { %v562_v51 = vmax.f32 %v558_v50, 0.0 }
  0xda   :  { %v564_v52 = vpack.c.bf16 %v562_v51, %v562_v51 }
  0xdb   :  { %v546_v53 = vpop.f32.mrf.mxu2 }
  0xdc   :  { %v559_v55 = vpop.f32.mrf.mxu3  ;;  %718 = vmatmul.bf16.vlgmr.msra.gmra.mxu1 %v564_v52 }
 0x139   :  { %v706_v2 = vpop.f32.mrf.mxu0 }
 0x13a   :  { %v707_v6 = vadd.f32 %v1273_v5, %v706_v2 }
 0x141   :  { %v708_v4 = vpop.f32.mrf.mxu0 }
 0x159   :  { %v719_v7 = vpop.f32.mrf.mxu1 }
 0x15a   :  { %v720_v8 = vadd.f32 %v719_v7, %v707_v6 }
 0x15c   :  { %v723_v9 = vmax.f32 %v720_v8, 0.0 }
 0x15e   :  { %v724_v10 = vpack.c.bf16 %v723_v9, %v723_v9 }
 0x160   :  { %801 = vmatmul.bf16.vlgmr.msra.gmra.mxu2 %v724_v10 }
 0x161   :  { %v721_v11 = vpop.f32.mrf.mxu1 }
 0x1e3   :  { %v802_v13 = vpop.f32.mrf.mxu2 }
 0x1e4   :  { %v803_v14 = vadd.f32 %v1274_v12, %v802_v13 }
 0x1e6   :  { %807 = vst.msk [vmem:[#allocation7] sm:$0x7f] %vm806_vm0, %v803_v14 }
 0x1e7   :  { %818 = dma.vmem_to_hbm [thread:$0]  %s814_s17, 128, %s816_s19, [#allocation4]  }
 0x1eb   :  { %v804_v15 = vpop.f32.mrf.mxu2 }
 0x1ec   :  { %1351 = dma.done.wait [#allocation4], 128  }
 0x1ed   :  { %1352 = vsyncadd [#allocation4], 4294967168 }
 0x1ee   :  { %823 = vsyncpa [#allocation3], 1 }
 0x1ef   :  { %824 = vsyncpa [#allocation6], 1 }
 0x1f0   :  { %825 = vsyncpa [#allocation4], 1 }

</bundles_post_ra>
